<compile_context>
chip_gen: v5e
topology: v5e:2x2
jax: 0.10.0
libtpu: 0.0.40
codegen_flags: <defaults>
</compile_context>

<pallas_src>
import functools

import jax
import jax.numpy as jnp
from jax.experimental import pallas as pl
from jax.experimental.pallas import tpu as pltpu

_LANE = 128
_BLOCK_ROWS = 8192          # (8192, 128) f32 = 4 MiB per block buffer
_MIN_BLOCK_ROWS = 256       # only split for megacore if rows >= 2 * this
_JNP_FALLBACK_ELEMS = 32768 # below ~128 KiB f32, fused XLA beats a kernel launch
_VMEM_LIMIT_BYTES = 32 * 1024 * 1024


def _round_up(v, m):
    return ((v + m - 1) // m) * m


def _pdf_flow_kernel(fp_ref, t_ref, x_ref, o_ref):
    # Folded scalar parameters live in SMEM: [p, q, r, A, B, C, D, E]
    p = fp_ref[0]
    q = fp_ref[1]
    r = fp_ref[2]
    A = fp_ref[3]
    B = fp_ref[4]
    C = fp_ref[5]
    D = fp_ref[6]
    E = fp_ref[7]

    # Upcast inside the kernel (in vregs) — no extra HBM pass for bf16 inputs.
    t = t_ref[...].astype(jnp.float32)
    x = x_ref[...].astype(jnp.float32)

    u = p * x + q * t + r
    y = A * x + B * t + C + D * jnp.sqrt(u * u + E)
    o_ref[...] = y.astype(o_ref.dtype)


def _fold_params(params, mode):
    """Fold the 8 module parameters into [p, q, r, A, B, C, D, E]."""
    a, b, c, a_, b_, c_, beta, alpha = [params[i] for i in range(8)]
    a2p1 = alpha * alpha + 1.0
    a2p2 = alpha * alpha + 2.0
    E = beta * beta / a2p2
    sq = jnp.sqrt(a2p2)
    if mode == "direct":
        p, q, r = a, b, c
        A = a_ * a2p1 * a
        B = a_ * a2p1 * b + b_
        C = a_ * a2p1 * c + c_
        D = a_ * alpha * sq
    else:  # inverse
        p = 1.0 / a_
        q = -b_ / a_
        r = -c_ / a_
        A = a2p1 / (a * a_)
        B = -(a2p1 * b_ / a_ + b) / a
        C = -(a2p1 * c_ / a_ + c) / a
        D = -(alpha / a) * sq
    return jnp.stack([p, q, r, A, B, C, D, E]).astype(jnp.float32)


def _apply_folded(fp, t, x):
    """Plain-JAX evaluation of the folded formula (tiny inputs / tail)."""
    out_dtype = x.dtype
    tf = t.astype(jnp.float32)
    xf = x.astype(jnp.float32)
    u = fp[0] * xf + fp[1] * tf + fp[2]
    y = fp[3] * xf + fp[4] * tf + fp[5] + fp[6] * jnp.sqrt(u * u + fp[7])
    return y.astype(out_dtype)


@functools.partial(jax.jit, static_argnames=("mode",))
def pdf_flow_forward(params, t, x, mode="direct"):
    """params: (8,) f32 [a, b, c, a_, b_, c_, beta, alpha]; t, x: same shape."""
    assert mode in ("direct", "inverse")
    assert t.shape == x.shape

    out_dtype = x.dtype
    orig_shape = x.shape
    n = x.size
    fp = _fold_params(params, mode)

    # Tiny inputs: launch + pipeline prologue dominate; fused XLA wins and a
    # grid=(1,) launch would also idle one v7x TensorCore.
    if n < _JNP_FALLBACK_ELEMS:
        return _apply_folded(fp, t, x)

    t_flat = t.reshape(-1)
    x_flat = x.reshape(-1)

    # Lane-aligned bulk goes through the kernel (pure reshape when aligned);
    # the <128-element tail (if any) is computed in plain JAX.
    n_bulk = (n // _LANE) * _LANE
    rows = n_bulk // _LANE

    if n_bulk == n:
        t_bulk, x_bulk = t_flat, x_flat
    else:
        t_bulk, x_bulk = t_flat[:n_bulk], x_flat[:n_bulk]
    t2 = t_bulk.reshape(rows, _LANE)
    x2 = x_bulk.reshape(rows, _LANE)

    # Block rows: large streaming tile; split medium inputs into >=2 grid
    # steps so both v7x TensorCores are used (no effect on v5e/v6e).
    if rows >= 2 * _MIN_BLOCK_ROWS:
        br = min(_BLOCK_ROWS, _round_up(pl.cdiv(rows, 2), 16))
    else:
        br = rows
    grid = (pl.cdiv(rows, br),)

    bytes_per_elem = t.dtype.itemsize + x.dtype.itemsize + out_dtype.itemsize

    out2 = pl.pallas_call(
        _pdf_flow_kernel,
        out_shape=jax.ShapeDtypeStruct((rows, _LANE), out_dtype),
        grid_spec=pltpu.PrefetchScalarGridSpec(
            num_scalar_prefetch=0,
            grid=grid,
            in_specs=[
                pl.BlockSpec(memory_space=pltpu.SMEM),        # folded scalars
                pl.BlockSpec((br, _LANE), lambda i: (i, 0)),  # t
                pl.BlockSpec((br, _LANE), lambda i: (i, 0)),  # x
            ],
            out_specs=pl.BlockSpec((br, _LANE), lambda i: (i, 0)),
        ),
        compiler_params=pltpu.CompilerParams(
            dimension_semantics=("parallel",),   # independent elementwise blocks
            vmem_limit_bytes=_VMEM_LIMIT_BYTES,  # covers 24 MiB double-buffered f32
        ),
        cost_estimate=pl.CostEstimate(
            flops=12 * n_bulk,
            transcendentals=n_bulk,
            bytes_accessed=bytes_per_elem * n_bulk,
        ),
    )(fp, t2, x2)

    out_flat = out2.reshape(-1)
    if n_bulk != n:
        tail = _apply_folded(fp, t_flat[n_bulk:], x_flat[n_bulk:])
        out_flat = jnp.concatenate([out_flat, tail])
    return out_flat.reshape(orig_shape)


def init_params(key):
    """Deterministic parameter init matching the PyTorch __init__ shapes."""
    k1, k2, k3, k4, k5, k6, k7, k8 = jax.random.split(key, 8)
    a = jnp.exp(jax.random.normal(k1, ()))          # exp(randn(1))
    b = jax.random.uniform(k2, ())                  # rand(1)
    c = jax.random.uniform(k3, ())                  # rand(1)
    a_ = jnp.exp(jax.random.normal(k4, ()))         # exp(randn(1))
    b_ = jax.random.uniform(k5, ())                 # rand(1)
    c_ = jax.random.uniform(k6, ())                 # rand(1)
    beta = jax.random.normal(k7, ())                # normal(0, 1)
    alpha = jax.random.normal(k8, ())               # normal(0, 1)
    return jnp.stack([a, b, c, a_, b_, c_, beta, alpha]).astype(jnp.float32)


def _reference(params, t, x, mode="direct"):
    a, b, c, a_, b_, c_, beta, alpha = [params[i] for i in range(8)]

    def act(u, m):
        s = jnp.sqrt((alpha**2 + 2) * u**2 + beta**2)
        return (alpha**2 + 1) * u + alpha * s if m == "direct" else (alpha**2 + 1) * u - alpha * s

    if mode == "direct":
        return a_ * act(a * x + b * t + c, "direct") + b_ * t + c_
    return (1 / a) * act((1 / a_) * x - (b_ / a_) * t - (c_ / a_), "inverse") - (b / a) * t - (c / a)


if __name__ == "__main__":
    key = jax.random.PRNGKey(0)
    kp, kt, kx, kt2, kx2, kt3, kx3 = jax.random.split(key, 7)

    params = init_params(kp)

    # 1) Kernel path, lane-aligned: 2*8*64*64 = 65536 elements -> 512 rows,
    #    split into a 2-step parallel grid (both v7x TCs active).
    shape = (2, 8, 64, 64)
    t = jax.random.normal(kt, shape, dtype=jnp.float32)
    x = jax.random.normal(kx, shape, dtype=jnp.float32)

    y_direct = pdf_flow_forward(params, t, x, mode="direct")
    y_inverse = pdf_flow_forward(params, t, y_direct, mode="inverse")
    jax.block_until_ready(y_direct)
    jax.block_until_ready(y_inverse)

    ref_d = _reference(params, t, x, mode="direct")
    ref_i = _reference(params, t, y_direct, mode="inverse")
    assert jnp.allclose(y_direct, ref_d, atol=1e-4, rtol=1e-5)
    assert jnp.allclose(y_inverse, ref_i, atol=1e-4, rtol=1e-5)
    # Flow invertibility (f32 cancellation in act_inv bounds this tolerance).
    assert jnp.allclose(y_inverse, x, atol=1e-3, rtol=1e-3)

    # 2) Kernel path, unaligned size: 3*5*67*73 = 73365 elements (tail of 21
    #    computed in plain JAX, bulk through the kernel with a partial block).
    shape_u = (3, 5, 67, 73)
    t_u = jax.random.normal(kt2, shape_u, dtype=jnp.float32)
    x_u = jax.random.normal(kx2, shape_u, dtype=jnp.float32)
    y_u = pdf_flow_forward(params, t_u, x_u, mode="direct")
    jax.block_until_ready(y_u)
    assert jnp.allclose(y_u, _reference(params, t_u, x_u, "direct"), atol=1e-4, rtol=1e-5)

    # 3) Kernel path, bf16 I/O (half the HBM traffic; math is f32 in-kernel).
    t_bf = t.astype(jnp.bfloat16)
    x_bf = x.astype(jnp.bfloat16)
    y_bf = pdf_flow_forward(params, t_bf, x_bf, mode="direct")
    jax.block_until_ready(y_bf)
    assert y_bf.dtype == jnp.bfloat16
    ref_bf = _reference(params, t_bf.astype(jnp.float32), x_bf.astype(jnp.float32), "direct")
    assert jnp.allclose(y_bf.astype(jnp.float32), ref_bf, atol=5e-2, rtol=5e-2)

    # 4) Tiny-input fallback (2048 elements): fused XLA path, no kernel launch.
    shape_s = (2, 4, 16, 16)
    t_s = jax.random.normal(kt3, shape_s, dtype=jnp.float32)
    x_s = jax.random.normal(kx3, shape_s, dtype=jnp.float32)
    y_s = pdf_flow_forward(params, t_s, x_s, mode="direct")
    jax.block_until_ready(y_s)
    assert jnp.allclose(y_s, _reference(params, t_s, x_s, "direct"), atol=1e-4, rtol=1e-5)

    print("KERNEL_OK")
</pallas_src>

<mosaic_0001>
module attributes {stable_mosaic.version = 11 : i64} {
  func.func @_pdf_flow_kernel(%arg0: i32, %arg1: memref<8xf32, #tpu.memory_space<smem>>, %arg2: memref<256x128xf32, #tpu.memory_space<vmem>>, %arg3: memref<256x128xf32, #tpu.memory_space<vmem>>, %arg4: memref<256x128xf32, #tpu.memory_space<vmem>>) attributes {dimension_semantics = [#tpu.dimension_semantics<parallel>], iteration_bounds = array<i64: 2>, scalar_prefetch = 0 : i64, scratch_operands = 0 : i64, tpu.core_type = #tpu.core_type<tc>, window_params = [{transform_indices = @transform_0, window_bounds = array<i64: 8>}, {transform_indices = @transform_1, window_bounds = array<i64: 256, 128>}, {transform_indices = @transform_2, window_bounds = array<i64: 256, 128>}, {transform_indices = @transform_3, window_bounds = array<i64: 256, 128>}]} {
    %c0 = arith.constant 0 : index
    %0 = memref.load %arg1[%c0] : memref<8xf32, #tpu.memory_space<smem>>
    %c1 = arith.constant 1 : index
    %1 = memref.load %arg1[%c1] : memref<8xf32, #tpu.memory_space<smem>>
    %c2 = arith.constant 2 : index
    %2 = memref.load %arg1[%c2] : memref<8xf32, #tpu.memory_space<smem>>
    %c3 = arith.constant 3 : index
    %3 = memref.load %arg1[%c3] : memref<8xf32, #tpu.memory_space<smem>>
    %c4 = arith.constant 4 : index
    %4 = memref.load %arg1[%c4] : memref<8xf32, #tpu.memory_space<smem>>
    %c5 = arith.constant 5 : index
    %5 = memref.load %arg1[%c5] : memref<8xf32, #tpu.memory_space<smem>>
    %c6 = arith.constant 6 : index
    %6 = memref.load %arg1[%c6] : memref<8xf32, #tpu.memory_space<smem>>
    %c7 = arith.constant 7 : index
    %7 = memref.load %arg1[%c7] : memref<8xf32, #tpu.memory_space<smem>>
    %c0_0 = arith.constant 0 : index
    %c0_1 = arith.constant 0 : index
    %8 = vector.load %arg2[%c0_0, %c0_1] : memref<256x128xf32, #tpu.memory_space<vmem>>, vector<256x128xf32>
    %c0_2 = arith.constant 0 : index
    %c0_3 = arith.constant 0 : index
    %9 = vector.load %arg3[%c0_2, %c0_3] : memref<256x128xf32, #tpu.memory_space<vmem>>, vector<256x128xf32>
    %10 = vector.broadcast %0 : f32 to vector<256x128xf32>
    %11 = arith.mulf %10, %9 : vector<256x128xf32>
    %12 = vector.broadcast %1 : f32 to vector<256x128xf32>
    %13 = arith.mulf %12, %8 : vector<256x128xf32>
    %14 = arith.addf %11, %13 : vector<256x128xf32>
    %15 = vector.broadcast %2 : f32 to vector<256x128xf32>
    %16 = arith.addf %14, %15 : vector<256x128xf32>
    %17 = vector.broadcast %3 : f32 to vector<256x128xf32>
    %18 = arith.mulf %17, %9 : vector<256x128xf32>
    %19 = vector.broadcast %4 : f32 to vector<256x128xf32>
    %20 = arith.mulf %19, %8 : vector<256x128xf32>
    %21 = arith.addf %18, %20 : vector<256x128xf32>
    %22 = vector.broadcast %5 : f32 to vector<256x128xf32>
    %23 = arith.addf %21, %22 : vector<256x128xf32>
    %24 = arith.mulf %16, %16 : vector<256x128xf32>
    %25 = vector.broadcast %7 : f32 to vector<256x128xf32>
    %26 = arith.addf %24, %25 : vector<256x128xf32>
    %27 = math.sqrt %26 : vector<256x128xf32>
    %28 = vector.broadcast %6 : f32 to vector<256x128xf32>
    %29 = arith.mulf %28, %27 : vector<256x128xf32>
    %30 = arith.addf %23, %29 : vector<256x128xf32>
    %c0_4 = arith.constant 0 : index
    %c0_5 = arith.constant 0 : index
    %31 = vector.load %arg4[%c0_4, %c0_5] : memref<256x128xf32, #tpu.memory_space<vmem>>, vector<256x128xf32>
    tpu.vector_store %arg4[%c0_4, %c0_5], %30 {strides = array<i32>} : memref<256x128xf32, #tpu.memory_space<vmem>>, vector<256x128xf32>,
    return
  }
  func.func @transform_0(%arg0: i32) -> i32 {
    %c0_i32 = arith.constant 0 : i32
    %c0_i32_0 = arith.constant 0 : i32
    return %c0_i32 : i32
  }
  func.func @transform_1(%arg0: i32) -> (i32, i32) {
    %c0_i32 = arith.constant 0 : i32
    %c0_i32_0 = arith.constant 0 : i32
    return %arg0, %c0_i32 : i32, i32
  }
  func.func @transform_2(%arg0: i32) -> (i32, i32) {
    %c0_i32 = arith.constant 0 : i32
    %c0_i32_0 = arith.constant 0 : i32
    return %arg0, %c0_i32 : i32, i32
  }
  func.func @transform_3(%arg0: i32) -> (i32, i32) {
    %c0_i32 = arith.constant 0 : i32
    %c0_i32_0 = arith.constant 0 : i32
    return %arg0, %c0_i32 : i32, i32
  }
}

</mosaic_0001>

<bundles_post_ra>
// kernel: pdf_flow_forward.1
= control target key start
LH: loop header
LB: loop body
LE: loop exit
PB: predicated region body
PF: predicated region fallthrough
CT: control target
= control target key end

     0   :  { %8 = vsyncpa [#allocation3], 0  ;;  %s1323_s12 = smov 0   ;;  %s2306_s0 = inlined_call_operand.vmem [shape: f32[8], index: 0, kind: input, shape index: {}]   ;;  %s2307_s1 = inlined_call_operand.vmem [shape: f32[512,128], index: 1, kind: input, shape index: {}]   ;;  %s2308_s2 = inlined_call_operand.vmem [shape: f32[512,128], index: 2, kind: input, shape index: {}]   ;;  %s2309_s3 = inlined_call_operand.vmem [shape: f32[512,128], index: 3, kind: output, shape index: {}]  }
   0x1 LB: > { %s1170_s13 = sadd.s32 4294967295, %s1300_s12   ;;  %p1172_p0 = scmp.ge.s32.totalorder %s1300_s12, 1  ;;  %s1300_s12 = sphi %s1323_s12, %s14_s12  }
   0x2   : > { %p118_p1 = scmp.lt.s32.totalorder %s1300_s12, 3  ;;  %s130_s16 = sshll.u32 %s2306_s0, 4  ;;  %s131_s16 = int_to_ptr.vmem [resolvable:$true] %s130_s16 }
   0x3   : > { %p1200_p3 = scmp.eq.s32.totalorder %s1170_s13, 0  ;;  %s1302_s17 = smov [#allocation2]  }
   0x4   : > { %p119_p2 = pnand %p1172_p0, %p118_p1 }
   0x6   : > { %p1196_p4 = pneg %p119_p2  ;;  %161 = sbr.rel (%p119_p2) target bundleno = 228 (0xe4), region = 32 }
   0x8   : > { %p1197_p5 = pnand %p1200_p3, %p1196_p4 }
   0xa   : > { %1199 = dma.vmem_to_smem (!%p1197_p5), %s131_s16, 16, %s1302_s17, [#allocation3]  }
   0xb   : > { %1295 = dma.done.wait (%p1200_p3), [#allocation3], 16  }
   0xc   : > { %1297 = vsyncadd (%p1200_p3), [#allocation3], 4294967280 }
   0xd   : > { %168 = sfence }
   0xe   : > { %s1177_s18 = sshll.u32 %s1170_s13, 5  ;;  %s210_s19 = sld [smem:[#allocation2]] }
   0xf   : > { %p193_p6 = scmp.lt.s32.totalorder %s1177_s18, 63  ;;  %s1183_s20 = sld [smem:[#allocation2 + $0x1]] }
  0x10   : > { %s1184_s21 = sld [smem:[#allocation2 + $0x2]] }
  0x11   : > { %s2311_s18 = smov (!%p193_p6, %s1177_s18), 63  ;;  %s1185_s22 = sld [smem:[#allocation2 + $0x3]] }
  0x12   : > { %s1334_s23 = sshll.u32 %s2311_s18, 3  ;;  %s1186_s24 = sld [smem:[#allocation2 + $0x4]] }
  0x13   : > { %s1340_s27 = scalar_lea.vmem %s2307_s1, %s1334_s23  ;;  %s1346_s30 = scalar_lea.vmem %s2308_s2, %s1334_s23 }
  0x14   : > { %v1348_v0 = vstv %s210_s19  ;;  %v218_v1 = vld [vmem:[%s1340_s27] sm:$0xff]  ;;  %v219_v4 = vld [vmem:[%s1340_s27 + $0x8] sm:$0xff]  ;;  %v220_v9 = vld [vmem:[%s1340_s27 + $0x10] sm:$0xff]  ;;  %s1189_s4 = sld [smem:[#allocation2 + $0x7]]  ;;  %s1497_s9 = scalar_lea.vmem %s2309_s3, %s1334_s23 }
  0x15   : > { %v250_v2 = vld [vmem:[%s1346_s30] sm:$0xff]  ;;  %v1352_v3 = vstv %s1183_s20  ;;  %v251_v7 = vld [vmem:[%s1346_s30 + $0x8] sm:$0xff]  ;;  %v252_v10 = vld [vmem:[%s1346_s30 + $0x10] sm:$0xff]  ;;  %s1187_s5 = sld [smem:[#allocation2 + $0x5]] }
  0x16   : > { %v283_v5 = vmul.f32 %v1348_v0, %v250_v2  ;;  %v316_v6 = vmul.f32 %v1352_v3, %v218_v1  ;;  %v317_v8 = vmul.f32 %v1352_v3, %v219_v4  ;;  %v1361_v11 = vstv %s1184_s21  ;;  %v221_v15 = vld [vmem:[%s1340_s27 + $0x18] sm:$0xff]  ;;  %s1188_s6 = sld [smem:[#allocation2 + $0x6]]  ;;  %v254_v40 = vld [vmem:[%s1346_s30 + $0x20] sm:$0xff]  ;;  %v255_v44 = vld [vmem:[%s1346_s30 + $0x28] sm:$0xff] }
  0x17   : > { %v284_v12 = vmul.f32 %v1348_v0, %v251_v7  ;;  %v285_v13 = vmul.f32 %v1348_v0, %v252_v10  ;;  %v318_v14 = vmul.f32 %v1352_v3, %v220_v9  ;;  %v253_v16 = vld [vmem:[%s1346_s30 + $0x18] sm:$0xff]  ;;  %v1368_v18 = vstv %s1185_s22  ;;  %v222_v41 = vld [vmem:[%s1340_s27 + $0x20] sm:$0xff]  ;;  %v223_v51 = vld [vmem:[%s1340_s27 + $0x28] sm:$0xff] }
  0x18   : > { %v348_v17 = vadd.f32 %v316_v6, %v283_v5  ;;  %v1370_v19 = vstv %s1186_s24  ;;  %v286_v23 = vmul.f32 %v1348_v0, %v253_v16  ;;  %v319_v24 = vmul.f32 %v1352_v3, %v221_v15  ;;  %v1420_v61 = vld [vmem:[%s1346_s30 + $0x30] sm:$0xff] }
  0x19   : > { %v349_v20 = vadd.f32 %v317_v8, %v284_v12  ;;  %v350_v22 = vadd.f32 %v318_v14, %v285_v13  ;;  %v414_v26 = vmul.f32 %v1368_v18, %v250_v2  ;;  %v447_v27 = vmul.f32 %v1370_v19, %v218_v1 }
  0x1a   : > { %v381_v21 = vadd.f32 %v1361_v11, %v348_v17  ;;  %v415_v29 = vmul.f32 %v1368_v18, %v251_v7  ;;  %v1379_v30 = vstv %s1189_s4  ;;  %v448_v31 = vmul.f32 %v1370_v19, %v219_v4 }
  0x1b   : > { %v382_v25 = vadd.f32 %v1361_v11, %v349_v20  ;;  %v383_v33 = vadd.f32 %v1361_v11, %v350_v22  ;;  %v416_v35 = vmul.f32 %v1368_v18, %v252_v10  ;;  %v449_v36 = vmul.f32 %v1370_v19, %v220_v9  ;;  %v1433_v9 = vld [vmem:[%s1340_s27 + $0x30] sm:$0xff] }
  0x1c   : > { %v544_v28 = vmul.f32 %v381_v21, %v381_v21  ;;  %v351_v37 = vadd.f32 %v319_v24, %v286_v23  ;;  %v479_v42 = vadd.f32 %v447_v27, %v414_v26  ;;  %v480_v43 = vadd.f32 %v448_v31, %v415_v29 }
  0x1d   : > { %v545_v32 = vmul.f32 %v382_v25, %v382_v25  ;;  %v546_v39 = vmul.f32 %v383_v33, %v383_v33  ;;  %v481_v45 = vadd.f32 %v449_v36, %v416_v35  ;;  %v287_v48 = vmul.f32 %v1348_v0, %v254_v40 }
  0x1e   : > { %v1384_v34 = vadd.f32 %v1379_v30, %v544_v28  ;;  %v384_v47 = vadd.f32 %v1361_v11, %v351_v37  ;;  %v1401_v49 = vstv %s1187_s5  ;;  %v320_v50 = vmul.f32 %v1352_v3, %v222_v41 }
  0x1f   : > { %v1389_v38 = vadd.f32 %v1379_v30, %v545_v32  ;;  %v1397_v46 = vadd.f32 %v1379_v30, %v546_v39  ;;  %v288_v52 = vmul.f32 %v1348_v0, %v255_v44  ;;  %v1407_v53 = vstv %s1188_s6 }
  0x20   : > { %1211 = vrsqrt.f32 %v1384_v34  ;;  %v547_v54 = vmul.f32 %v384_v47, %v384_v47  ;;  %v352_v55 = vadd.f32 %v320_v50, %v287_v48  ;;  %v1410_v57 = vadd.f32 %v1401_v49, %v479_v42 }
  0x21   : > { %1213 = vrsqrt.f32 %v1389_v38  ;;  %v1413_v58 = vadd.f32 %v1401_v49, %v480_v43  ;;  %v1416_v59 = vadd.f32 %v1401_v49, %v481_v45  ;;  %v321_v60 = vmul.f32 %v1352_v3, %v223_v51 }
  0x22   : > { %1215 = vrsqrt.f32 %v1397_v46  ;;  %v417_v1 = vmul.f32 %v1368_v18, %v253_v16  ;;  %v1425_v2 = vadd.f32 %v1379_v30, %v547_v54  ;;  %v385_v4 = vadd.f32 %v1361_v11, %v352_v55 }
  0x23   : > { %vm616_vm0 = vcmp.eq.f32.partialorder %v1384_v34, inf  ;;  %v619_v5 = vand.u32 2147483648, %v1384_v34  ;;  %v450_v7 = vmul.f32 %v1370_v19, %v221_v15  ;;  %v353_v8 = vadd.f32 %v321_v60, %v288_v52 }
  0x24   : > { %vm618_vm1 = vcmp.eq.f32.partialorder %v1384_v34, 0.0  ;;  %vm628_vm2 = vcmp.eq.f32.partialorder %v1389_v38, inf  ;;  %1217 = vrsqrt.f32 %v1425_v2  ;;  %v418_v12 = vmul.f32 %v1368_v18, %v254_v40 }
  0x25   : > { %v289_v13 = vmul.f32 %v1348_v0, %v1420_v61  ;;  %vm630_vm3 = vcmp.eq.f32.partialorder %v1389_v38, 0.0  ;;  %v451_v15 = vmul.f32 %v1370_v19, %v222_v41  ;;  %v548_v17 = vmul.f32 %v385_v4, %v385_v4 }
  0x26   : > { %v1212_v56 = vpop.eup %1211  ;;  %v386_v20 = vadd.f32 %v1361_v11, %v353_v8  ;;  %v631_v22 = vand.u32 2147483648, %v1389_v38  ;;  %v322_v24 = vmul.f32 %v1352_v3, %v1433_v9  ;;  %vm640_vm4 = vcmp.eq.f32.partialorder %v1397_v46, inf }
  0x27   : > { %v1214_v62 = vpop.eup %1213  ;;  %v610_v63 = vmul.f32 %v1212_v56, %v1384_v34  ;;  %v1450_v26 = vadd.f32 %v1379_v30, %v548_v17  ;;  %v482_v31 = vadd.f32 %v450_v7, %v417_v1  ;;  %v483_v35 = vadd.f32 %v451_v15, %v418_v12  ;;  %v1477_v1 = vld [vmem:[%s1346_s30 + $0x38] sm:$0xff] }
  0x28   : > { %v622_v6 = vmul.f32 %v1214_v62, %v1389_v38  ;;  %v1216_v14 = vpop.eup %1215  ;;  %v549_v27 = vmul.f32 %v386_v20, %v386_v20  ;;  %v354_v32 = vadd.f32 %v322_v24, %v289_v13  ;;  %v419_v36 = vmul.f32 %v1368_v18, %v255_v44 }
  0x29   : > { %v611_v10 = vmul.f32 %v1212_v56, %v610_v63  ;;  %v634_v23 = vmul.f32 %v1216_v14, %v1397_v46  ;;  %1219 = vrsqrt.f32 %v1450_v26  ;;  %v452_v41 = vmul.f32 %v1370_v19, %v223_v51 }
  0x2a   : > { %v623_v16 = vmul.f32 %v1214_v62, %v622_v6  ;;  %v1218_v37 = vpop.eup %1217  ;;  %v1456_v42 = vadd.f32 %v1379_v30, %v549_v27  ;;  %vm642_vm5 = vcmp.eq.f32.partialorder %v1397_v46, 0.0  ;;  %v387_v47 = vadd.f32 %v1361_v11, %v354_v32  ;;  %v1520_v32 = vld [vmem:[%s1340_s27 + $0x40] sm:$0xff] }
  0x2b   : > { %v612_v21 = vmul.f32 0.5, %v611_v10  ;;  %v635_v29 = vmul.f32 %v1216_v14, %v634_v23  ;;  %v646_v45 = vmul.f32 %v1218_v37, %v1425_v2  ;;  %v643_v44 = vand.u32 2147483648, %v1397_v46  ;;  %v1486_v10 = vld [vmem:[%s1340_s27 + $0x38] sm:$0xff] }
  0x2c   : > { %v624_v25 = vmul.f32 0.5, %v623_v16  ;;  %1221 = vrsqrt.f32 %v1456_v42  ;;  %v1466_v52 = vadd.f32 %v1401_v49, %v482_v31  ;;  %v1469_v55 = vadd.f32 %v1401_v49, %v483_v35 }
  0x2d   : > { %v613_v28 = vsub.f32 1.5, %v612_v21  ;;  %v636_v40 = vmul.f32 0.5, %v635_v29  ;;  %v647_v54 = vmul.f32 %v1218_v37, %v646_v45  ;;  %v550_v63 = vmul.f32 %v387_v47, %v387_v47 }
  0x2e   : > { %v625_v33 = vsub.f32 1.5, %v624_v25  ;;  %vm652_vm6 = vcmp.eq.f32.partialorder %v1425_v2, inf  ;;  %v323_v23 = vmul.f32 %v1352_v3, %v1486_v10  ;;  %vm654_vm7 = vcmp.eq.f32.partialorder %v1425_v2, 0.0 }
  0x2f   : > { %v614_v39 = vmul.f32 %v1212_v56, %v613_v28  ;;  %v637_v50 = vsub.f32 1.5, %v636_v40  ;;  %v1220_v4 = vpop.eup %1219  ;;  %v648_v8 = vmul.f32 0.5, %v647_v54  ;;  %v1501_v15 = vadd.f32 %v1379_v30, %v550_v63 }
  0x30   : > { %v626_v43 = vmul.f32 %v1214_v62, %v625_v33  ;;  %v1474_v62 = vadd.f32 %v452_v41, %v419_v36  ;;  %v658_v16 = vmul.f32 %v1220_v4, %v1450_v26  ;;  %v258_v33 = vld [vmem:[%s1346_s30 + $0x40] sm:$0xff]  ;;  %v420_v35 = vmul.f32 %v1368_v18, %v1420_v61 }
  0x31   : > { %v615_v48 = vmul.f32 %v614_v39, %v1384_v34  ;;  %v638_v60 = vmul.f32 %v1216_v14, %v637_v50  ;;  %1223 = vrsqrt.f32 %v1501_v15  ;;  %v453_v39 = vmul.f32 %v1370_v19, %v1433_v9 }
  0x32   : > { %v627_v51 = vmul.f32 %v626_v43, %v1389_v38  ;;  %v1222_v17 = vpop.eup %1221  ;;  %v291_v45 = vmul.f32 %v1348_v0, %v258_v33  ;;  %v324_v47 = vmul.f32 %v1352_v3, %v1520_v32  ;;  %vm664_vm8 = vcmp.eq.f32.partialorder %v1450_v26, inf }
  0x33   : > { %v617_v56 = vsel %vm616_vm0, %v1384_v34, %v615_v48  ;;  %v639_v14 = vmul.f32 %v638_v60, %v1397_v46  ;;  %v670_v28 = vmul.f32 %v1222_v17, %v1456_v42  ;;  %v667_v50 = vand.u32 2147483648, %v1450_v26 }
  0x34   : > { %v620_v6 = vsel %vm618_vm1, %v619_v5, %v617_v56  ;;  %v629_v7 = vsel %vm628_vm2, %v1389_v38, %v627_v51  ;;  %v649_v5 = vsub.f32 1.5, %v648_v8  ;;  %v290_v38 = vmul.f32 %v1348_v0, %v1477_v1 }
  0x35   : > { %v994_v12 = vmul.f32 %v1407_v53, %v620_v6  ;;  %v632_v13 = vsel %vm630_vm3, %v631_v22, %v629_v7  ;;  %v641_v21 = vsel %vm640_vm4, %v1397_v46, %v639_v14  ;;  %v659_v22 = vmul.f32 %v1220_v4, %v658_v16 }
  0x36   : > { %v995_v34 = vmul.f32 %v1407_v53, %v632_v13  ;;  %v644_v25 = vsel %vm642_vm5, %v643_v44, %v641_v21  ;;  %v650_v27 = vmul.f32 %v1218_v37, %v649_v5  ;;  %v671_v46 = vmul.f32 %v1222_v17, %v670_v28  ;;  %v259_v13 = vld [vmem:[%s1346_s30 + $0x48] sm:$0xff] }
  0x37   : > { %v1026_v20 = vadd.f32 %v994_v12, %v1410_v57  ;;  %v996_v29 = vmul.f32 %v1407_v53, %v644_v25  ;;  %v655_v57 = vand.u32 2147483648, %v1425_v2  ;;  %v660_v31 = vmul.f32 0.5, %v659_v22  ;;  %v1224_v51 = vpop.eup %1223  ;;  %v227_v5 = vld [vmem:[%s1340_s27 + $0x48] sm:$0xff] }
  0x38   : > { %v1027_v24 = vadd.f32 %v995_v34, %v1413_v58  ;;  %v651_v58 = vmul.f32 %v650_v27, %v1425_v2  ;;  %v355_v40 = vadd.f32 %v323_v23, %v290_v38  ;;  %v672_v43 = vmul.f32 0.5, %v671_v46 }
  0x39   : > { %1058 = vst [vmem:[%s1497_s9] sm:$0xff] %v1026_v20  ;;  %v1028_v36 = vadd.f32 %v996_v29, %v1416_v59  ;;  %v661_v37 = vsub.f32 1.5, %v660_v31  ;;  %vm666_vm9 = vcmp.eq.f32.partialorder %v1450_v26, 0.0  ;;  %vm676_vm10 = vcmp.eq.f32.partialorder %v1456_v42, inf  ;;  %v260_v31 = vld [vmem:[%s1346_s30 + $0x50] sm:$0xff] }
  0x3a   : > { %1059 = vst [vmem:[%s1497_s9 + $0x8] sm:$0xff] %v1027_v24  ;;  %v653_v41 = vsel %vm652_vm6, %v1425_v2, %v651_v58  ;;  %v388_v59 = vadd.f32 %v1361_v11, %v355_v40  ;;  %v673_v44 = vsub.f32 1.5, %v672_v43  ;;  %v356_v2 = vadd.f32 %v324_v47, %v291_v45 }
  0x3b   : > { %1060 = vst [vmem:[%s1497_s9 + $0x10] sm:$0xff] %v1028_v36  ;;  %v656_v48 = vsel %vm654_vm7, %v655_v57, %v653_v41  ;;  %v662_v61 = vmul.f32 %v1220_v4, %v661_v37  ;;  %v682_v4 = vmul.f32 %v1224_v51, %v1501_v15  ;;  %vm678_vm11 = vcmp.eq.f32.partialorder %v1456_v42, 0.0  ;;  %v1588_v37 = vld [vmem:[%s1340_s27 + $0x58] sm:$0xff] }
  0x3c   : > { %v997_v9 = vmul.f32 %v1407_v53, %v656_v48  ;;  %v551_v56 = vmul.f32 %v388_v59, %v388_v59  ;;  %v674_v63 = vmul.f32 %v1222_v17, %v673_v44  ;;  %v389_v6 = vadd.f32 %v1361_v11, %v356_v2 }
  0x3d   : > { %v663_v54 = vmul.f32 %v662_v61, %v1450_v26  ;;  %v679_v8 = vand.u32 2147483648, %v1456_v42  ;;  %v517_v17 = vadd.f32 %v1401_v49, %v1474_v62  ;;  %v292_v22 = vmul.f32 %v1348_v0, %v259_v13 }
  0x3e   : > { %v1029_v60 = vadd.f32 %v997_v9, %v1466_v52  ;;  %v1552_v12 = vadd.f32 %v1379_v30, %v551_v56  ;;  %v675_v16 = vmul.f32 %v674_v63, %v1456_v42  ;;  %v683_v52 = vmul.f32 %v1224_v51, %v682_v4 }
  0x3f   : > { %v665_v7 = vsel %vm664_vm8, %v1450_v26, %v663_v54  ;;  %v552_v34 = vmul.f32 %v389_v6, %v389_v6  ;;  %v485_v26 = vadd.f32 %v453_v39, %v420_v35  ;;  %v325_v27 = vmul.f32 %v1352_v3, %v227_v5 }
  0x40   : > { %1061 = vst [vmem:[%s1497_s9 + $0x18] sm:$0xff] %v1029_v60  ;;  %v668_v14 = vsel %vm666_vm9, %v667_v50, %v665_v7  ;;  %1225 = vrsqrt.f32 %v1552_v12  ;;  %v677_v20 = vsel %vm676_vm10, %v1456_v42, %v675_v16  ;;  %v684_v21 = vmul.f32 0.5, %v683_v52 }
  0x41   : > { %v998_v38 = vmul.f32 %v1407_v53, %v668_v14  ;;  %v680_v24 = vsel %vm678_vm11, %v679_v8, %v677_v20  ;;  %v1570_v25 = vadd.f32 %v1379_v30, %v552_v34  ;;  %v421_v29 = vmul.f32 %v1368_v18, %v1477_v1  ;;  %v1629_v20 = vld [vmem:[%s1346_s30 + $0x60] sm:$0xff] }
  0x42   : > { %v999_v62 = vmul.f32 %v1407_v53, %v680_v24  ;;  %v685_v28 = vsub.f32 1.5, %v684_v21  ;;  %v454_v57 = vmul.f32 %v1370_v19, %v1486_v10  ;;  %v518_v42 = vadd.f32 %v1401_v49, %v485_v26  ;;  %v1591_v10 = vld [vmem:[%s1346_s30 + $0x58] sm:$0xff] }
  0x43   : > { %v1030_v23 = vadd.f32 %v998_v38, %v1469_v55  ;;  %v228_v55 = vld [vmem:[%s1340_s27 + $0x50] sm:$0xff]  ;;  %v422_v58 = vmul.f32 %v1368_v18, %v258_v33  ;;  %v455_v46 = vmul.f32 %v1370_v19, %v1520_v32  ;;  %1227 = vrsqrt.f32 %v1570_v25 }
  0x44   : > { %v1031_v35 = vadd.f32 %v999_v62, %v517_v17  ;;  %v686_v36 = vmul.f32 %v1224_v51, %v685_v28  ;;  %vm688_vm12 = vcmp.eq.f32.partialorder %v1501_v15, inf  ;;  %v357_v1 = vadd.f32 %v325_v27, %v292_v22  ;;  %v1633_v27 = vld [vmem:[%s1340_s27 + $0x60] sm:$0xff] }
  0x45   : > { %1062 = vst [vmem:[%s1497_s9 + $0x20] sm:$0xff] %v1030_v23  ;;  %vm690_vm13 = vcmp.eq.f32.partialorder %v1501_v15, 0.0  ;;  %v691_v40 = vand.u32 2147483648, %v1501_v15  ;;  %v293_v33 = vmul.f32 %v1348_v0, %v260_v31  ;;  %v326_v32 = vmul.f32 %v1352_v3, %v228_v55 }
  0x46   : > { %v1226_v39 = vpop.eup %1225  ;;  %1063 = vst [vmem:[%s1497_s9 + $0x28] sm:$0xff] %v1031_v35  ;;  %v687_v41 = vmul.f32 %v686_v36, %v1501_v15  ;;  %v486_v43 = vadd.f32 %v454_v57, %v421_v29  ;;  %v390_v47 = vadd.f32 %v1361_v11, %v357_v1  ;;  %v487_v48 = vadd.f32 %v455_v46, %v422_v58  ;;  %v1645_v58 = vld [vmem:[%s1346_s30 + $0x68] sm:$0xff] }
  0x47   : > { %v694_v45 = vmul.f32 %v1226_v39, %v1552_v12  ;;  %v358_v61 = vadd.f32 %v326_v32, %v293_v33  ;;  %v294_v59 = vmul.f32 %v1348_v0, %v1591_v10  ;;  %v327_v9 = vmul.f32 %v1352_v3, %v1588_v37  ;;  %v1660_v33 = vld [vmem:[%s1340_s27 + $0x68] sm:$0xff] }
  0x48   : > { %v689_v50 = vsel %vm688_vm12, %v1501_v15, %v687_v41  ;;  %v423_v2 = vmul.f32 %v1368_v18, %v259_v13  ;;  %v553_v51 = vmul.f32 %v390_v47, %v390_v47  ;;  %v456_v60 = vmul.f32 %v1370_v19, %v227_v5 }
  0x49   : > { %v695_v44 = vmul.f32 %v1226_v39, %v694_v45  ;;  %v1228_v54 = vpop.eup %1227  ;;  %v692_v56 = vsel %vm690_vm13, %v691_v40, %v689_v50  ;;  %v391_v63 = vadd.f32 %v1361_v11, %v358_v61  ;;  %v359_v4 = vadd.f32 %v327_v9, %v294_v59 }
  0x4a   : > { %v1000_v6 = vmul.f32 %v1407_v53, %v692_v56  ;;  %v706_v8 = vmul.f32 %v1228_v54, %v1570_v25  ;;  %v1616_v14 = vadd.f32 %v1379_v30, %v553_v51  ;;  %v424_v13 = vmul.f32 %v1368_v18, %v260_v31 }
  0x4b   : > { %v696_v7 = vmul.f32 0.5, %v695_v44  ;;  %v457_v15 = vmul.f32 %v1370_v19, %v228_v55  ;;  %v554_v16 = vmul.f32 %v391_v63, %v391_v63  ;;  %v392_v52 = vadd.f32 %v1361_v11, %v359_v4  ;;  %v1688_v63 = vld [vmem:[%s1346_s30 + $0x70] sm:$0xff] }
  0x4c   : > { %v1032_v34 = vadd.f32 %v1000_v6, %v518_v42  ;;  %v707_v38 = vmul.f32 %v1228_v54, %v706_v8  ;;  %1229 = vrsqrt.f32 %v1616_v14  ;;  %v519_v26 = vadd.f32 %v1401_v49, %v486_v43 }
  0x4d   : > { %v697_v5 = vsub.f32 1.5, %v696_v7  ;;  %vm700_vm14 = vcmp.eq.f32.partialorder %v1552_v12, inf  ;;  %vm702_vm15 = vcmp.eq.f32.partialorder %v1552_v12, 0.0  ;;  %v1626_v17 = vadd.f32 %v1379_v30, %v554_v16 }
  0x4e   : > { %1064 = vst [vmem:[%s1497_s9 + $0x30] sm:$0xff] %v1032_v34  ;;  %v708_v22 = vmul.f32 0.5, %v707_v38  ;;  %v488_v23 = vadd.f32 %v456_v60, %v423_v2  ;;  %v555_v24 = vmul.f32 %v392_v52, %v392_v52  ;;  %v703_v62 = vand.u32 2147483648, %v1552_v12 }
  0x4f   : > { %v698_v21 = vmul.f32 %v1226_v39, %v697_v5  ;;  %v520_v28 = vadd.f32 %v1401_v49, %v487_v48  ;;  %v489_v29 = vadd.f32 %v457_v15, %v424_v13  ;;  %1231 = vrsqrt.f32 %v1626_v17  ;;  %v1694_v15 = vld [vmem:[%s1340_s27 + $0x70] sm:$0xff] }
  0x50   : > { %v709_v55 = vsub.f32 1.5, %v708_v22  ;;  %v1640_v31 = vadd.f32 %v1379_v30, %v555_v24  ;;  %v295_v42 = vmul.f32 %v1348_v0, %v1629_v20  ;;  %vm712_vm0 = vcmp.eq.f32.partialorder %v1570_v25, inf }
  0x51   : > { %v699_v57 = vmul.f32 %v698_v21, %v1552_v12  ;;  %vm714_vm1 = vcmp.eq.f32.partialorder %v1570_v25, 0.0  ;;  %v715_v46 = vand.u32 2147483648, %v1570_v25  ;;  %v328_v35 = vmul.f32 %v1352_v3, %v1633_v27 }
  0x52   : > { %v1230_v36 = vpop.eup %1229  ;;  %v710_v39 = vmul.f32 %v1228_v54, %v709_v55  ;;  %v1656_v40 = vadd.f32 %v1401_v49, %v488_v23  ;;  %1233 = vrsqrt.f32 %v1640_v31  ;;  %v425_v43 = vmul.f32 %v1368_v18, %v1591_v10 }
  0x53   : > { %v701_v1 = vsel %vm700_vm14, %v1552_v12, %v699_v57  ;;  %v718_v41 = vmul.f32 %v1230_v36, %v1616_v14  ;;  %v296_v45 = vmul.f32 %v1348_v0, %v1645_v58  ;;  %v1672_v61 = vadd.f32 %v1401_v49, %v489_v29 }
  0x54   : > { %v704_v32 = vsel %vm702_vm15, %v703_v62, %v701_v1  ;;  %v711_v48 = vmul.f32 %v710_v39, %v1570_v25  ;;  %v360_v59 = vadd.f32 %v328_v35, %v295_v42  ;;  %vm724_vm2 = vcmp.eq.f32.partialorder %v1616_v14, inf }
  0x55   : > { %v1001_v47 = vmul.f32 %v1407_v53, %v704_v32  ;;  %v1232_v12 = vpop.eup %1231  ;;  %v719_v9 = vmul.f32 %v1230_v36, %v718_v41  ;;  %v458_v10 = vmul.f32 %v1370_v19, %v1588_v37  ;;  %v329_v50 = vmul.f32 %v1352_v3, %v1660_v33  ;;  %v1724_v41 = vld [vmem:[%s1340_s27 + $0x78] sm:$0xff] }
  0x56   : > { %v713_v2 = vsel %vm712_vm0, %v1570_v25, %v711_v48  ;;  %v730_v51 = vmul.f32 %v1232_v12, %v1626_v17  ;;  %v393_v54 = vadd.f32 %v1361_v11, %v360_v59  ;;  %vm726_vm3 = vcmp.eq.f32.partialorder %v1616_v14, 0.0 }
  0x57   : > { %v1033_v44 = vadd.f32 %v1001_v47, %v519_v26  ;;  %v716_v56 = vsel %vm714_vm1, %v715_v46, %v713_v2  ;;  %v720_v60 = vmul.f32 0.5, %v719_v9  ;;  %v361_v37 = vadd.f32 %v329_v50, %v296_v45 }
  0x58   : > { %v1234_v4 = vpop.eup %1233  ;;  %v1002_v6 = vmul.f32 %v1407_v53, %v716_v56  ;;  %v727_v7 = vand.u32 2147483648, %v1616_v14  ;;  %v731_v8 = vmul.f32 %v1232_v12, %v730_v51  ;;  %v556_v13 = vmul.f32 %v393_v54, %v393_v54 }
  0x59   : > { %1065 = vst [vmem:[%s1497_s9 + $0x38] sm:$0xff] %v1033_v44  ;;  %v721_v16 = vsub.f32 1.5, %v720_v60  ;;  %v490_v25 = vadd.f32 %v458_v10, %v425_v43  ;;  %v742_v52 = vmul.f32 %v1234_v4, %v1640_v31  ;;  %v394_v34 = vadd.f32 %v1361_v11, %v361_v37  ;;  %v1727_v43 = vld [vmem:[%s1346_s30 + $0x78] sm:$0xff] }
  0x5a   : > { %v1034_v5 = vadd.f32 %v1002_v6, %v520_v28  ;;  %v732_v38 = vmul.f32 0.5, %v731_v8  ;;  %v1699_v26 = vadd.f32 %v1379_v30, %v556_v13  ;;  %v297_v21 = vmul.f32 %v1348_v0, %v1688_v63  ;;  %v1759_v8 = vld [vmem:[%s1346_s30 + $0x80] sm:$0xff] }
  0x5b   : > { %v722_v22 = vmul.f32 %v1230_v36, %v721_v16  ;;  %v743_v23 = vmul.f32 %v1234_v4, %v742_v52  ;;  %v557_v24 = vmul.f32 %v394_v34, %v394_v34  ;;  %v330_v62 = vmul.f32 %v1352_v3, %v1694_v15 }
  0x5c   : > { %1066 = vst [vmem:[%s1497_s9 + $0x40] sm:$0xff] %v1034_v5  ;;  %v733_v29 = vsub.f32 1.5, %v732_v38  ;;  %vm736_vm4 = vcmp.eq.f32.partialorder %v1626_v17, inf  ;;  %vm738_vm5 = vcmp.eq.f32.partialorder %v1626_v17, 0.0  ;;  %1235 = vrsqrt.f32 %v1699_v26 }
  0x5d   : > { %v723_v28 = vmul.f32 %v722_v22, %v1616_v14  ;;  %v739_v57 = vand.u32 2147483648, %v1626_v17  ;;  %v744_v55 = vmul.f32 0.5, %v743_v23  ;;  %v1712_v42 = vadd.f32 %v1379_v30, %v557_v24  ;;  %v1781_v23 = vld [vmem:[%s1346_s30 + $0x88] sm:$0xff] }
  0x5e   : > { %v734_v46 = vmul.f32 %v1232_v12, %v733_v29  ;;  %v426_v35 = vmul.f32 %v1368_v18, %v1629_v20  ;;  %v459_v36 = vmul.f32 %v1370_v19, %v1633_v27  ;;  %v362_v1 = vadd.f32 %v330_v62, %v297_v21  ;;  %v1771_v21 = vld [vmem:[%s1340_s27 + $0x80] sm:$0xff] }
  0x5f   : > { %v725_v39 = vsel %vm724_vm2, %v1616_v14, %v723_v28  ;;  %v745_v32 = vsub.f32 1.5, %v744_v55  ;;  %vm748_vm6 = vcmp.eq.f32.partialorder %v1640_v31, inf  ;;  %1237 = vrsqrt.f32 %v1712_v42 }
  0x60   : > { %v728_v20 = vsel %vm726_vm3, %v727_v7, %v725_v39  ;;  %v735_v45 = vmul.f32 %v734_v46, %v1626_v17  ;;  %vm750_vm7 = vcmp.eq.f32.partialorder %v1640_v31, 0.0  ;;  %v427_v27 = vmul.f32 %v1368_v18, %v1645_v58 }
  0x61   : > { %v1003_v47 = vmul.f32 %v1407_v53, %v728_v20  ;;  %v746_v48 = vmul.f32 %v1234_v4, %v745_v32  ;;  %v460_v59 = vmul.f32 %v1370_v19, %v1660_v33  ;;  %v395_v12 = vadd.f32 %v1361_v11, %v362_v1 }
  0x62   : > { %v1236_v9 = vpop.eup %1235  ;;  %v737_v14 = vsel %vm736_vm4, %v1626_v17, %v735_v45  ;;  %v751_v10 = vand.u32 2147483648, %v1640_v31  ;;  %v298_v50 = vmul.f32 %v1348_v0, %v1727_v43  ;;  %v331_v58 = vmul.f32 %v1352_v3, %v1724_v41 }
  0x63   : > { %v1035_v44 = vadd.f32 %v1003_v47, %v1656_v40  ;;  %v740_v33 = vsel %vm738_vm5, %v739_v57, %v737_v14  ;;  %v747_v2 = vmul.f32 %v746_v48, %v1640_v31  ;;  %v754_v51 = vmul.f32 %v1236_v9, %v1699_v26 }
  0x64   : > { %v1004_v54 = vmul.f32 %v1407_v53, %v740_v33  ;;  %v523_v56 = vadd.f32 %v1401_v49, %v490_v25  ;;  %v558_v60 = vmul.f32 %v395_v12, %v395_v12  ;;  %v363_v37 = vadd.f32 %v331_v58, %v298_v50  ;;  %v1816_v58 = vld [vmem:[%s1346_s30 + $0x90] sm:$0xff] }
  0x65   : > { %v1238_v4 = vpop.eup %1237  ;;  %1067 = vst [vmem:[%s1497_s9 + $0x48] sm:$0xff] %v1035_v44  ;;  %v749_v40 = vsel %vm748_vm6, %v1640_v31, %v747_v2  ;;  %v491_v17 = vadd.f32 %v459_v36, %v426_v35  ;;  %v755_v6 = vmul.f32 %v1236_v9, %v754_v51  ;;  %v492_v7 = vadd.f32 %v460_v59, %v427_v27 }
  0x66   : > { %v1036_v13 = vadd.f32 %v1004_v54, %v1672_v61  ;;  %v752_v16 = vsel %vm750_vm7, %v751_v10, %v749_v40  ;;  %v766_v25 = vmul.f32 %v1238_v4, %v1712_v42  ;;  %v1766_v52 = vadd.f32 %v1379_v30, %v558_v60  ;;  %v1778_v61 = vld [vmem:[%s1340_s27 + $0x88] sm:$0xff] }
  0x67   : > { %v1005_v34 = vmul.f32 %v1407_v53, %v752_v16  ;;  %v756_v5 = vmul.f32 0.5, %v755_v6  ;;  %v396_v38 = vadd.f32 %v1361_v11, %v363_v37  ;;  %v299_v31 = vmul.f32 %v1348_v0, %v1759_v8 }
  0x68   : > { %1068 = vst [vmem:[%s1497_s9 + $0x50] sm:$0xff] %v1036_v13  ;;  %v767_v22 = vmul.f32 %v1238_v4, %v766_v25  ;;  %1239 = vrsqrt.f32 %v1766_v52  ;;  %v524_v62 = vadd.f32 %v1401_v49, %v491_v17  ;;  %v525_v28 = vadd.f32 %v1401_v49, %v492_v7 }
  0x69   : > { %v1037_v24 = vadd.f32 %v1005_v34, %v523_v56  ;;  %v757_v29 = vsub.f32 1.5, %v756_v5  ;;  %vm760_vm8 = vcmp.eq.f32.partialorder %v1699_v26, inf  ;;  %v559_v55 = vmul.f32 %v396_v38, %v396_v38 }
  0x6a   : > { %v768_v57 = vmul.f32 0.5, %v767_v22  ;;  %v332_v46 = vmul.f32 %v1352_v3, %v1771_v21  ;;  %vm762_vm9 = vcmp.eq.f32.partialorder %v1699_v26, 0.0  ;;  %v300_v36 = vmul.f32 %v1348_v0, %v1781_v23 }
  0x6b   : > { %1069 = vst [vmem:[%s1497_s9 + $0x58] sm:$0xff] %v1037_v24  ;;  %v758_v35 = vmul.f32 %v1236_v9, %v757_v29  ;;  %v333_v1 = vmul.f32 %v1352_v3, %v1778_v61  ;;  %v763_v39 = vand.u32 2147483648, %v1699_v26  ;;  %v1796_v20 = vadd.f32 %v1379_v30, %v559_v55  ;;  %v1852_v29 = vld [vmem:[%s1340_s27 + $0x98] sm:$0xff] }
  0x6c   : > { %v769_v32 = vsub.f32 1.5, %v768_v57  ;;  %v364_v45 = vadd.f32 %v332_v46, %v299_v31  ;;  %v428_v47 = vmul.f32 %v1368_v18, %v1688_v63  ;;  %v461_v48 = vmul.f32 %v1370_v19, %v1694_v15  ;;  %v1813_v15 = vld [vmem:[%s1340_s27 + $0x90] sm:$0xff]  ;;  %v1855_v57 = vld [vmem:[%s1346_s30 + $0x98] sm:$0xff] }
  0x6d   : > { %v759_v27 = vmul.f32 %v758_v35, %v1699_v26  ;;  %v365_v59 = vadd.f32 %v333_v1, %v300_v36  ;;  %vm772_vm10 = vcmp.eq.f32.partialorder %v1712_v42, inf  ;;  %vm774_vm11 = vcmp.eq.f32.partialorder %v1712_v42, 0.0 }
  0x6e   : > { %v1240_v12 = vpop.eup %1239  ;;  %v770_v9 = vmul.f32 %v1238_v4, %v769_v32  ;;  %1241 = vrsqrt.f32 %v1796_v20  ;;  %v775_v10 = vand.u32 2147483648, %v1712_v42  ;;  %v397_v50 = vadd.f32 %v1361_v11, %v364_v45 }
  0x6f   : > { %v761_v14 = vsel %vm760_vm8, %v1699_v26, %v759_v27  ;;  %v778_v63 = vmul.f32 %v1240_v12, %v1766_v52  ;;  %v429_v2 = vmul.f32 %v1368_v18, %v1727_v43  ;;  %v398_v51 = vadd.f32 %v1361_v11, %v365_v59 }
  0x70   : > { %v764_v44 = vsel %vm762_vm9, %v763_v39, %v761_v14  ;;  %v771_v33 = vmul.f32 %v770_v9, %v1712_v42  ;;  %v462_v60 = vmul.f32 %v1370_v19, %v1724_v41  ;;  %v560_v37 = vmul.f32 %v397_v50, %v397_v50 }
  0x71   : > { %v1006_v54 = vmul.f32 %v1407_v53, %v764_v44  ;;  %v779_v56 = vmul.f32 %v1240_v12, %v778_v63  ;;  %v561_v4 = vmul.f32 %v398_v51, %v398_v51  ;;  %v301_v40 = vmul.f32 %v1348_v0, %v1816_v58  ;;  %v1884_v44 = vld [vmem:[%s1346_s30 + $0xa0] sm:$0xff] }
  0x72   : > { %v773_v26 = vsel %vm772_vm10, %v1712_v42, %v771_v33  ;;  %v334_v43 = vmul.f32 %v1352_v3, %v1813_v15  ;;  %v1837_v41 = vadd.f32 %v1379_v30, %v560_v37  ;;  %v493_v25 = vadd.f32 %v461_v48, %v428_v47 }
  0x73   : > { %v1038_v17 = vadd.f32 %v1006_v54, %v524_v62  ;;  %v776_v6 = vsel %vm774_vm11, %v775_v10, %v773_v26  ;;  %v780_v7 = vmul.f32 0.5, %v779_v56  ;;  %v1841_v34 = vadd.f32 %v1379_v30, %v561_v4  ;;  %v1890_v56 = vld [vmem:[%s1340_s27 + $0xa0] sm:$0xff] }
  0x74   : > { %v1242_v13 = vpop.eup %1241  ;;  %v1007_v16 = vmul.f32 %v1407_v53, %v776_v6  ;;  %v366_v5 = vadd.f32 %v334_v43, %v301_v40  ;;  %v494_v22 = vadd.f32 %v462_v60, %v429_v2  ;;  %1243 = vrsqrt.f32 %v1837_v41 }
  0x75   : > { %1070 = vst [vmem:[%s1497_s9 + $0x60] sm:$0xff] %v1038_v17  ;;  %v781_v38 = vsub.f32 1.5, %v780_v7  ;;  %v790_v42 = vmul.f32 %v1242_v13, %v1796_v20  ;;  %v430_v24 = vmul.f32 %v1368_v18, %v1759_v8  ;;  %v463_v62 = vmul.f32 %v1370_v19, %v1771_v21 }
  0x76   : > { %v1039_v31 = vadd.f32 %v1007_v16, %v525_v28  ;;  %1245 = vrsqrt.f32 %v1841_v34  ;;  %vm784_vm12 = vcmp.eq.f32.partialorder %v1766_v52, inf  ;;  %vm786_vm13 = vcmp.eq.f32.partialorder %v1766_v52, 0.0 }
  0x77   : > { %v782_v55 = vmul.f32 %v1240_v12, %v781_v38  ;;  %v791_v46 = vmul.f32 %v1242_v13, %v790_v42  ;;  %v787_v28 = vand.u32 2147483648, %v1766_v52  ;;  %v431_v8 = vmul.f32 %v1368_v18, %v1781_v23 }
  0x78   : > { %1071 = vst [vmem:[%s1497_s9 + $0x68] sm:$0xff] %v1039_v31  ;;  %v464_v21 = vmul.f32 %v1370_v19, %v1778_v61  ;;  %v399_v35 = vadd.f32 %v1361_v11, %v366_v5  ;;  %v302_v39 = vmul.f32 %v1348_v0, %v1855_v57  ;;  %v335_v32 = vmul.f32 %v1352_v3, %v1852_v29 }
  0x79   : > { %v783_v36 = vmul.f32 %v782_v55, %v1766_v52  ;;  %v792_v1 = vmul.f32 0.5, %v791_v46  ;;  %v526_v45 = vadd.f32 %v1401_v49, %v493_v25  ;;  %v527_v27 = vadd.f32 %v1401_v49, %v494_v22  ;;  %v1916_v55 = vld [vmem:[%s1346_s30 + $0xa8] sm:$0xff] }
  0x7a   : > { %v495_v23 = vadd.f32 %v463_v62, %v430_v24  ;;  %v562_v47 = vmul.f32 %v399_v35, %v399_v35  ;;  %v1244_v61 = vpop.eup %1243  ;;  %vm796_vm14 = vcmp.eq.f32.partialorder %v1796_v20, inf  ;;  %v367_v12 = vadd.f32 %v335_v32, %v302_v39 }
  0x7b   : > { %v785_v48 = vsel %vm784_vm12, %v1766_v52, %v783_v36  ;;  %v793_v59 = vsub.f32 1.5, %v792_v1  ;;  %v802_v10 = vmul.f32 %v1244_v61, %v1837_v41  ;;  %v496_v63 = vadd.f32 %v464_v21, %v431_v8  ;;  %v1924_v21 = vld [vmem:[%s1340_s27 + $0xa8] sm:$0xff] }
  0x7c   : > { %v1246_v9 = vpop.eup %1245  ;;  %v788_v14 = vsel %vm786_vm13, %v787_v28, %v785_v48  ;;  %v1881_v50 = vadd.f32 %v1379_v30, %v562_v47  ;;  %v400_v54 = vadd.f32 %v1361_v11, %v367_v12  ;;  %vm798_vm15 = vcmp.eq.f32.partialorder %v1796_v20, 0.0 }
  0x7d   : > { %v1008_v33 = vmul.f32 %v1407_v53, %v788_v14  ;;  %v794_v2 = vmul.f32 %v1242_v13, %v793_v59  ;;  %v814_v51 = vmul.f32 %v1246_v9, %v1841_v34  ;;  %v799_v52 = vand.u32 2147483648, %v1796_v20 }
  0x7e   : > { %v803_v60 = vmul.f32 %v1244_v61, %v802_v10  ;;  %1247 = vrsqrt.f32 %v1881_v50  ;;  %v303_v40 = vmul.f32 %v1348_v0, %v1884_v44  ;;  %v528_v43 = vadd.f32 %v1401_v49, %v495_v23 }
  0x7f   : > { %v1040_v37 = vadd.f32 %v1008_v33, %v526_v45  ;;  %v795_v26 = vmul.f32 %v794_v2, %v1796_v20  ;;  %v815_v4 = vmul.f32 %v1246_v9, %v814_v51  ;;  %v563_v6 = vmul.f32 %v400_v54, %v400_v54 }
  0x80   : > { %v804_v17 = vmul.f32 0.5, %v803_v60  ;;  %v336_v7 = vmul.f32 %v1352_v3, %v1890_v56  ;;  %vm808_vm0 = vcmp.eq.f32.partialorder %v1837_v41, inf  ;;  %v529_v16 = vadd.f32 %v1401_v49, %v496_v63  ;;  %v1949_v63 = vld [vmem:[%s1346_s30 + $0xb0] sm:$0xff] }
  0x81   : > { %1072 = vst [vmem:[%s1497_s9 + $0x70] sm:$0xff] %v1040_v37  ;;  %v797_v13 = vsel %vm796_vm14, %v1796_v20, %v795_v26  ;;  %v816_v25 = vmul.f32 0.5, %v815_v4  ;;  %vm810_vm1 = vcmp.eq.f32.partialorder %v1837_v41, 0.0  ;;  %v1911_v22 = vadd.f32 %v1379_v30, %v563_v6  ;;  %v1961_v37 = vld [vmem:[%s1340_s27 + $0xb0] sm:$0xff] }
  0x82   : > { %v800_v5 = vsel %vm798_vm15, %v799_v52, %v797_v13  ;;  %v805_v38 = vsub.f32 1.5, %v804_v17  ;;  %v811_v31 = vand.u32 2147483648, %v1837_v41  ;;  %v368_v62 = vadd.f32 %v336_v7, %v303_v40  ;;  %v1971_v13 = vld [vmem:[%s1340_s27 + $0xb8] sm:$0xff] }
  0x83   : > { %v1009_v42 = vmul.f32 %v1407_v53, %v800_v5  ;;  %v817_v24 = vsub.f32 1.5, %v816_v25  ;;  %v432_v20 = vmul.f32 %v1368_v18, %v1816_v58  ;;  %v465_v8 = vmul.f32 %v1370_v19, %v1813_v15  ;;  %v1974_v25 = vld [vmem:[%s1346_s30 + $0xb8] sm:$0xff] }
  0x84   : > { %v1248_v46 = vpop.eup %1247  ;;  %v806_v28 = vmul.f32 %v1244_v61, %v805_v38  ;;  %1249 = vrsqrt.f32 %v1911_v22  ;;  %vm820_vm2 = vcmp.eq.f32.partialorder %v1841_v34, inf  ;;  %v823_v32 = vand.u32 2147483648, %v1841_v34 }
  0x85   : > { %v1041_v35 = vadd.f32 %v1009_v42, %v527_v27  ;;  %v818_v36 = vmul.f32 %v1246_v9, %v817_v24  ;;  %v826_v1 = vmul.f32 %v1248_v46, %v1881_v50  ;;  %v401_v58 = vadd.f32 %v1361_v11, %v368_v62 }
  0x86   : > { %v807_v39 = vmul.f32 %v806_v28, %v1837_v41  ;;  %v304_v15 = vmul.f32 %v1348_v0, %v1916_v55  ;;  %vm822_vm3 = vcmp.eq.f32.partialorder %v1841_v34, 0.0  ;;  %v337_v23 = vmul.f32 %v1352_v3, %v1924_v21 }
  0x87   : > { %1073 = vst [vmem:[%s1497_s9 + $0x78] sm:$0xff] %v1041_v35  ;;  %v819_v45 = vmul.f32 %v818_v36, %v1841_v34  ;;  %v827_v27 = vmul.f32 %v1248_v46, %v826_v1  ;;  %v497_v61 = vadd.f32 %v465_v8, %v432_v20  ;;  %v433_v48 = vmul.f32 %v1368_v18, %v1855_v57  ;;  %v1997_v1 = vld [vmem:[%s1346_s30 + $0xc0] sm:$0xff] }
  0x88   : > { %v809_v47 = vsel %vm808_vm0, %v1837_v41, %v807_v39  ;;  %v564_v59 = vmul.f32 %v401_v58, %v401_v58  ;;  %v369_v10 = vadd.f32 %v337_v23, %v304_v15  ;;  %v466_v57 = vmul.f32 %v1370_v19, %v1852_v29  ;;  %v2003_v15 = vld [vmem:[%s1340_s27 + $0xc0] sm:$0xff] }
  0x89   : > { %v812_v12 = vsel %vm810_vm1, %v811_v31, %v809_v47  ;;  %v821_v9 = vsel %vm820_vm2, %v1841_v34, %v819_v45  ;;  %v828_v14 = vmul.f32 0.5, %v827_v27  ;;  %v434_v4 = vmul.f32 %v1368_v18, %v1884_v44 }
  0x8a   : > { %v1250_v33 = vpop.eup %1249  ;;  %v1010_v2 = vmul.f32 %v1407_v53, %v812_v12  ;;  %v824_v51 = vsel %vm822_vm3, %v823_v32, %v821_v9  ;;  %v1955_v41 = vadd.f32 %v1379_v30, %v564_v59  ;;  %v402_v60 = vadd.f32 %v1361_v11, %v369_v10 }
  0x8b   : > { %v1011_v54 = vmul.f32 %v1407_v53, %v824_v51  ;;  %v829_v34 = vsub.f32 1.5, %v828_v14  ;;  %v838_v52 = vmul.f32 %v1250_v33, %v1911_v22  ;;  %v305_v29 = vmul.f32 %v1348_v0, %v1949_v63 }
  0x8c   : > { %v1042_v26 = vadd.f32 %v1010_v2, %v528_v43  ;;  %1251 = vrsqrt.f32 %v1955_v41  ;;  %v467_v7 = vmul.f32 %v1370_v19, %v1890_v56  ;;  %vm832_vm4 = vcmp.eq.f32.partialorder %v1881_v50, inf }
  0x8d   : > { %v1043_v40 = vadd.f32 %v1011_v54, %v529_v16  ;;  %v830_v17 = vmul.f32 %v1248_v46, %v829_v34  ;;  %v839_v6 = vmul.f32 %v1250_v33, %v838_v52  ;;  %v835_v44 = vand.u32 2147483648, %v1881_v50 }
  0x8e   : > { %1074 = vst [vmem:[%s1497_s9 + $0x80] sm:$0xff] %v1042_v26  ;;  %v565_v43 = vmul.f32 %v402_v60, %v402_v60  ;;  %v338_v5 = vmul.f32 %v1352_v3, %v1961_v37  ;;  %v530_v16 = vadd.f32 %v1401_v49, %v497_v61  ;;  %vm834_vm5 = vcmp.eq.f32.partialorder %v1881_v50, 0.0 }
  0x8f   : > { %1075 = vst [vmem:[%s1497_s9 + $0x88] sm:$0xff] %v1043_v40  ;;  %v831_v38 = vmul.f32 %v830_v17, %v1881_v50  ;;  %v840_v56 = vmul.f32 0.5, %v839_v6  ;;  %v306_v24 = vmul.f32 %v1348_v0, %v1974_v25  ;;  %v339_v62 = vmul.f32 %v1352_v3, %v1971_v13  ;;  %v2030_v40 = vld [vmem:[%s1340_s27 + $0xc8] sm:$0xff] }
  0x90   : > { %v1986_v42 = vadd.f32 %v1379_v30, %v565_v43  ;;  %v370_v31 = vadd.f32 %v338_v5, %v305_v29  ;;  %v498_v28 = vadd.f32 %v466_v57, %v433_v48  ;;  %v499_v8 = vadd.f32 %v467_v7, %v434_v4  ;;  %v2033_v17 = vld [vmem:[%s1346_s30 + $0xc8] sm:$0xff] }
  0x91   : > { %v833_v46 = vsel %vm832_vm4, %v1881_v50, %v831_v38  ;;  %v841_v20 = vsub.f32 1.5, %v840_v56  ;;  %vm844_vm6 = vcmp.eq.f32.partialorder %v1911_v22, inf  ;;  %vm846_vm7 = vcmp.eq.f32.partialorder %v1911_v22, 0.0 }
  0x92   : > { %v1252_v35 = vpop.eup %1251  ;;  %v836_v36 = vsel %vm834_vm5, %v835_v44, %v833_v46  ;;  %1253 = vrsqrt.f32 %v1986_v42  ;;  %v847_v58 = vand.u32 2147483648, %v1911_v22  ;;  %v435_v45 = vmul.f32 %v1368_v18, %v1916_v55 }
  0x93   : > { %v1012_v39 = vmul.f32 %v1407_v53, %v836_v36  ;;  %v842_v32 = vmul.f32 %v1250_v33, %v841_v20  ;;  %v850_v50 = vmul.f32 %v1252_v35, %v1955_v41  ;;  %v468_v27 = vmul.f32 %v1370_v19, %v1924_v21 }
  0x94   : > { %v403_v23 = vadd.f32 %v1361_v11, %v370_v31  ;;  %v371_v47 = vadd.f32 %v339_v62, %v306_v24  ;;  %v307_v12 = vmul.f32 %v1348_v0, %v1997_v1  ;;  %v340_v55 = vmul.f32 %v1352_v3, %v2003_v15 }
  0x95   : > { %v1044_v61 = vadd.f32 %v1012_v39, %v530_v16  ;;  %v843_v48 = vmul.f32 %v842_v32, %v1911_v22  ;;  %v851_v59 = vmul.f32 %v1252_v35, %v850_v50  ;;  %v531_v21 = vadd.f32 %v1401_v49, %v498_v28  ;;  %v2063_v39 = vld [vmem:[%s1346_s30 + $0xd0] sm:$0xff] }
  0x96   : > { %v566_v9 = vmul.f32 %v403_v23, %v403_v23  ;;  %v404_v14 = vadd.f32 %v1361_v11, %v371_v47  ;;  %v532_v33 = vadd.f32 %v1401_v49, %v499_v8  ;;  %v372_v52 = vadd.f32 %v340_v55, %v307_v12 }
  0x97   : > { %1076 = vst [vmem:[%s1497_s9 + $0x90] sm:$0xff] %v1044_v61  ;;  %v845_v10 = vsel %vm844_vm6, %v1911_v22, %v843_v48  ;;  %v852_v2 = vmul.f32 0.5, %v851_v59  ;;  %v500_v4 = vadd.f32 %v468_v27, %v435_v45  ;;  %vm856_vm8 = vcmp.eq.f32.partialorder %v1955_v41, inf  ;;  %v2074_v27 = vld [vmem:[%s1340_s27 + $0xd0] sm:$0xff]  ;;  %v2081_v48 = vld [vmem:[%s1346_s30 + $0xd8] sm:$0xff] }
  0x98   : > { %v1254_v51 = vpop.eup %1253  ;;  %v848_v57 = vsel %vm846_vm7, %v847_v58, %v845_v10  ;;  %v2025_v54 = vadd.f32 %v1379_v30, %v566_v9  ;;  %v567_v34 = vmul.f32 %v404_v14, %v404_v14  ;;  %v436_v22 = vmul.f32 %v1368_v18, %v1949_v63 }
  0x99   : > { %v1013_v60 = vmul.f32 %v1407_v53, %v848_v57  ;;  %v853_v26 = vsub.f32 1.5, %v852_v2  ;;  %v862_v29 = vmul.f32 %v1254_v51, %v1986_v42  ;;  %v469_v6 = vmul.f32 %v1370_v19, %v1961_v37  ;;  %v2092_v57 = vld [vmem:[%s1340_s27 + $0xd8] sm:$0xff] }
  0x9a   : > { %1255 = vrsqrt.f32 %v2025_v54  ;;  %v2042_v5 = vadd.f32 %v1379_v30, %v567_v34  ;;  %v859_v16 = vand.u32 2147483648, %v1955_v41  ;;  %v405_v38 = vadd.f32 %v1361_v11, %v372_v52 }
  0x9b   : > { %v1045_v7 = vadd.f32 %v1013_v60, %v531_v21  ;;  %v854_v44 = vmul.f32 %v1252_v35, %v853_v26  ;;  %v863_v43 = vmul.f32 %v1254_v51, %v862_v29  ;;  %v308_v56 = vmul.f32 %v1348_v0, %v2033_v17 }
  0x9c   : > { %v341_v63 = vmul.f32 %v1352_v3, %v2030_v40  ;;  %vm858_vm9 = vcmp.eq.f32.partialorder %v1955_v41, 0.0  ;;  %1257 = vrsqrt.f32 %v2042_v5  ;;  %v437_v24 = vmul.f32 %v1368_v18, %v1974_v25 }
  0x9d   : > { %1077 = vst [vmem:[%s1497_s9 + $0x98] sm:$0xff] %v1045_v7  ;;  %v855_v37 = vmul.f32 %v854_v44, %v1955_v41  ;;  %v864_v31 = vmul.f32 0.5, %v863_v43  ;;  %v470_v62 = vmul.f32 %v1370_v19, %v1971_v13  ;;  %v568_v46 = vmul.f32 %v405_v38, %v405_v38 }
  0x9e   : > { %v373_v28 = vadd.f32 %v341_v63, %v308_v56  ;;  %v533_v8 = vadd.f32 %v1401_v49, %v500_v4  ;;  %v501_v36 = vadd.f32 %v469_v6, %v436_v22  ;;  %vm868_vm10 = vcmp.eq.f32.partialorder %v1986_v42, inf }
  0x9f   : > { %v857_v20 = vsel %vm856_vm8, %v1955_v41, %v855_v37  ;;  %v865_v35 = vsub.f32 1.5, %v864_v31  ;;  %v2067_v13 = vadd.f32 %v1379_v30, %v568_v46  ;;  %vm870_vm11 = vcmp.eq.f32.partialorder %v1986_v42, 0.0  ;;  %v2120_v46 = vld [vmem:[%s1346_s30 + $0xe0] sm:$0xff] }
  0xa0   : > { %v1256_v32 = vpop.eup %1255  ;;  %v860_v58 = vsel %vm858_vm9, %v859_v16, %v857_v20  ;;  %v406_v25 = vadd.f32 %v1361_v11, %v373_v28  ;;  %v871_v23 = vand.u32 2147483648, %v1986_v42  ;;  %v502_v47 = vadd.f32 %v470_v62, %v437_v24  ;;  %v2117_v62 = vld [vmem:[%s1340_s27 + $0xe0] sm:$0xff] }
  0xa1   : > { %v1014_v50 = vmul.f32 %v1407_v53, %v860_v58  ;;  %v866_v45 = vmul.f32 %v1254_v51, %v865_v35  ;;  %v874_v41 = vmul.f32 %v1256_v32, %v2025_v54  ;;  %1259 = vrsqrt.f32 %v2067_v13 }
  0xa2   : > { %v309_v61 = vmul.f32 %v1348_v0, %v2063_v39  ;;  %v1258_v59 = vpop.eup %1257  ;;  %v438_v55 = vmul.f32 %v1368_v18, %v1997_v1  ;;  %v471_v10 = vmul.f32 %v1370_v19, %v2003_v15  ;;  %v569_v2 = vmul.f32 %v406_v25, %v406_v25 }
  0xa3   : > { %v1046_v12 = vadd.f32 %v1014_v50, %v532_v33  ;;  %v867_v9 = vmul.f32 %v866_v45, %v1986_v42  ;;  %v875_v14 = vmul.f32 %v1256_v32, %v874_v41  ;;  %v886_v21 = vmul.f32 %v1258_v59, %v2042_v5 }
  0xa4   : > { %v342_v51 = vmul.f32 %v1352_v3, %v2074_v27  ;;  %v534_v34 = vadd.f32 %v1401_v49, %v501_v36  ;;  %v310_v1 = vmul.f32 %v1348_v0, %v2081_v48  ;;  %v2104_v26 = vadd.f32 %v1379_v30, %v569_v2 }
  0xa5   : > { %1078 = vst [vmem:[%s1497_s9 + $0xa0] sm:$0xff] %v1046_v12  ;;  %v869_v33 = vsel %vm868_vm10, %v1986_v42, %v867_v9  ;;  %v876_v52 = vmul.f32 0.5, %v875_v14  ;;  %v887_v60 = vmul.f32 %v1258_v59, %v886_v21  ;;  %v535_v6 = vadd.f32 %v1401_v49, %v502_v47 }
  0xa6   : > { %v872_v15 = vsel %vm870_vm11, %v871_v23, %v869_v33  ;;  %v374_v4 = vadd.f32 %v342_v51, %v309_v61  ;;  %v343_v7 = vmul.f32 %v1352_v3, %v2092_v57  ;;  %vm880_vm12 = vcmp.eq.f32.partialorder %v2025_v54, inf }
  0xa7   : > { %v1015_v29 = vmul.f32 %v1407_v53, %v872_v15  ;;  %v877_v22 = vsub.f32 1.5, %v876_v52  ;;  %v1260_v44 = vpop.eup %1259  ;;  %v888_v42 = vmul.f32 0.5, %v887_v60  ;;  %v503_v43 = vadd.f32 %v471_v10, %v438_v55  ;;  %v2163_v60 = vld [vmem:[%s1340_s27 + $0xe8] sm:$0xff] }
  0xa8   : > { %1261 = vrsqrt.f32 %v2104_v26  ;;  %vm882_vm13 = vcmp.eq.f32.partialorder %v2025_v54, 0.0  ;;  %v898_v56 = vmul.f32 %v1260_v44, %v2067_v13  ;;  %v883_v63 = vand.u32 2147483648, %v2025_v54 }
  0xa9   : > { %v1047_v16 = vadd.f32 %v1015_v29, %v533_v8  ;;  %v878_v38 = vmul.f32 %v1256_v32, %v877_v22  ;;  %v889_v37 = vsub.f32 1.5, %v888_v42  ;;  %v407_v31 = vadd.f32 %v1361_v11, %v374_v4 }
  0xaa   : > { %v375_v24 = vadd.f32 %v343_v7, %v310_v1  ;;  %vm892_vm14 = vcmp.eq.f32.partialorder %v2042_v5, inf  ;;  %vm894_vm15 = vcmp.eq.f32.partialorder %v2042_v5, 0.0  ;;  %v899_v20 = vmul.f32 %v1260_v44, %v898_v56 }
  0xab   : > { %1079 = vst [vmem:[%s1497_s9 + $0xa8] sm:$0xff] %v1047_v16  ;;  %v879_v28 = vmul.f32 %v878_v38, %v2025_v54  ;;  %v890_v8 = vmul.f32 %v1258_v59, %v889_v37  ;;  %v895_v35 = vand.u32 2147483648, %v2042_v5  ;;  %v570_v36 = vmul.f32 %v407_v31, %v407_v31 }
  0xac   : > { %v408_v32 = vadd.f32 %v1361_v11, %v375_v24  ;;  %v900_v25 = vmul.f32 0.5, %v899_v20  ;;  %v311_v50 = vmul.f32 %v1348_v0, %v2120_v46  ;;  %v344_v45 = vmul.f32 %v1352_v3, %v2117_v62  ;;  %v2186_v24 = vld [vmem:[%s1340_s27 + $0xf0] sm:$0xff] }
  0xad   : > { %v881_v58 = vsel %vm880_vm12, %v2025_v54, %v879_v28  ;;  %v891_v47 = vmul.f32 %v890_v8, %v2042_v5  ;;  %v2139_v61 = vadd.f32 %v1379_v30, %v570_v36  ;;  %v439_v14 = vmul.f32 %v1368_v18, %v2033_v17  ;;  %v2189_v28 = vld [vmem:[%s1346_s30 + $0xf0] sm:$0xff] }
  0xae   : > { %v1262_v41 = vpop.eup %1261  ;;  %v884_v23 = vsel %vm882_vm13, %v883_v63, %v881_v58  ;;  %v571_v59 = vmul.f32 %v408_v32, %v408_v32  ;;  %v901_v9 = vsub.f32 1.5, %v900_v25  ;;  %vm904_vm0 = vcmp.eq.f32.partialorder %v2067_v13, inf }
  0xaf   : > { %v1016_v12 = vmul.f32 %v1407_v53, %v884_v23  ;;  %v910_v55 = vmul.f32 %v1262_v41, %v2104_v26  ;;  %v893_v54 = vsel %vm892_vm14, %v2042_v5, %v891_v47  ;;  %v472_v21 = vmul.f32 %v1370_v19, %v2030_v40  ;;  %v2166_v5 = vld [vmem:[%s1346_s30 + $0xe8] sm:$0xff] }
  0xb0   : > { %1263 = vrsqrt.f32 %v2139_v61  ;;  %v896_v2 = vsel %vm894_vm15, %v895_v35, %v893_v54  ;;  %v902_v17 = vmul.f32 %v1260_v44, %v901_v9  ;;  %v907_v52 = vand.u32 2147483648, %v2067_v13 }
  0xb1   : > { %v1048_v10 = vadd.f32 %v1016_v12, %v534_v34  ;;  %v911_v51 = vmul.f32 %v1262_v41, %v910_v55  ;;  %v1017_v33 = vmul.f32 %v1407_v53, %v896_v2  ;;  %v2157_v1 = vadd.f32 %v1379_v30, %v571_v59  ;;  %v2217_v2 = vld [vmem:[%s1346_s30 + $0xf8] sm:$0xff] }
  0xb2   : > { %v376_v15 = vadd.f32 %v344_v45, %v311_v50  ;;  %v903_v40 = vmul.f32 %v902_v17, %v2067_v13  ;;  %vm906_vm1 = vcmp.eq.f32.partialorder %v2067_v13, 0.0  ;;  %v536_v29 = vadd.f32 %v1401_v49, %v503_v43 }
  0xb3   : > { %1080 = vst [vmem:[%s1497_s9 + $0xb0] sm:$0xff] %v1048_v10  ;;  %v912_v34 = vmul.f32 0.5, %v911_v51  ;;  %v1049_v4 = vadd.f32 %v1017_v33, %v535_v6  ;;  %v504_v22 = vadd.f32 %v472_v21, %v439_v14  ;;  %1265 = vrsqrt.f32 %v2157_v1  ;;  %v2214_v10 = vld [vmem:[%s1340_s27 + $0xf8] sm:$0xff] }
  0xb4   : > { %v905_v7 = vsel %vm904_vm0, %v2067_v13, %v903_v40  ;;  %v440_v42 = vmul.f32 %v1368_v18, %v2063_v39  ;;  %v409_v16 = vadd.f32 %v1361_v11, %v376_v15  ;;  %v473_v43 = vmul.f32 %v1370_v19, %v2074_v27 }
  0xb5   : > { %v913_v44 = vsub.f32 1.5, %v912_v34  ;;  %1081 = vst [vmem:[%s1497_s9 + $0xb8] sm:$0xff] %v1049_v4  ;;  %v908_v6 = vsel %vm906_vm1, %v907_v52, %v905_v7  ;;  %v312_v56 = vmul.f32 %v1348_v0, %v2166_v5  ;;  %v345_v63 = vmul.f32 %v1352_v3, %v2163_v60 }
  0xb6   : > { %v1264_v38 = vpop.eup %1263  ;;  %v1018_v13 = vmul.f32 %v1407_v53, %v908_v6  ;;  %v572_v39 = vmul.f32 %v409_v16, %v409_v16  ;;  %vm916_vm2 = vcmp.eq.f32.partialorder %v2104_v26, inf  ;;  %vm918_vm3 = vcmp.eq.f32.partialorder %v2104_v26, 0.0 }
  0xb7   : > { %v914_v37 = vmul.f32 %v1262_v41, %v913_v44  ;;  %v922_v31 = vmul.f32 %v1264_v38, %v2139_v61  ;;  %v919_v27 = vand.u32 2147483648, %v2104_v26  ;;  %v377_v20 = vadd.f32 %v345_v63, %v312_v56 }
  0xb8   : > { %v1050_v8 = vadd.f32 %v1018_v13, %v536_v29  ;;  %v2196_v32 = vadd.f32 %v1379_v30, %v572_v39  ;;  %v537_v25 = vadd.f32 %v1401_v49, %v504_v22  ;;  %v313_v45 = vmul.f32 %v1348_v0, %v2189_v28 }
  0xb9   : > { %v915_v35 = vmul.f32 %v914_v37, %v2104_v26  ;;  %v923_v36 = vmul.f32 %v1264_v38, %v922_v31  ;;  %v1266_v58 = vpop.eup %1265  ;;  %v410_v50 = vadd.f32 %v1361_v11, %v377_v20  ;;  %v346_v41 = vmul.f32 %v1352_v3, %v2186_v24 }
  0xba   : > { %1082 = vst [vmem:[%s1497_s9 + $0xc0] sm:$0xff] %v1050_v8  ;;  %v934_v59 = vmul.f32 %v1266_v58, %v2157_v1  ;;  %1267 = vrsqrt.f32 %v2196_v32  ;;  %v505_v9 = vadd.f32 %v473_v43, %v440_v42  ;;  %v441_v54 = vmul.f32 %v1368_v18, %v2081_v48 }
  0xbb   : > { %v917_v23 = vsel %vm916_vm2, %v2104_v26, %v915_v35  ;;  %v924_v47 = vmul.f32 0.5, %v923_v36  ;;  %vm928_vm4 = vcmp.eq.f32.partialorder %v2139_v61, inf  ;;  %v474_v17 = vmul.f32 %v1370_v19, %v2092_v57 }
  0xbc   : > { %v920_v12 = vsel %vm918_vm3, %v919_v27, %v917_v23  ;;  %v935_v21 = vmul.f32 %v1266_v58, %v934_v59  ;;  %v573_v26 = vmul.f32 %v410_v50, %v410_v50  ;;  %v378_v51 = vadd.f32 %v346_v41, %v313_v45 }
  0xbd   : > { %v1019_v14 = vmul.f32 %v1407_v53, %v920_v12  ;;  %v925_v55 = vsub.f32 1.5, %v924_v47  ;;  %v931_v15 = vand.u32 2147483648, %v2139_v61  ;;  %v314_v4 = vmul.f32 %v1348_v0, %v2217_v2 }
  0xbe   : > { %v936_v40 = vmul.f32 0.5, %v935_v21  ;;  %v2224_v48 = vadd.f32 %v1379_v30, %v573_v26  ;;  %v411_v34 = vadd.f32 %v1361_v11, %v378_v51  ;;  %v347_v29 = vmul.f32 %v1352_v3, %v2214_v10 }
  0xbf   : > { %v1051_v33 = vadd.f32 %v1019_v14, %v537_v25  ;;  %v926_v52 = vmul.f32 %v1264_v38, %v925_v55  ;;  %vm930_vm5 = vcmp.eq.f32.partialorder %v2139_v61, 0.0  ;;  %v538_v44 = vadd.f32 %v1401_v49, %v505_v9 }
  0xc0   : > { %v1268_v22 = vpop.eup %1267  ;;  %v937_v7 = vsub.f32 1.5, %v936_v40  ;;  %v506_v42 = vadd.f32 %v474_v17, %v441_v54  ;;  %1269 = vrsqrt.f32 %v2224_v48  ;;  %vm940_vm6 = vcmp.eq.f32.partialorder %v2157_v1, inf }
  0xc1   : > { %1083 = vst [vmem:[%s1497_s9 + $0xc8] sm:$0xff] %v1051_v33  ;;  %v927_v57 = vmul.f32 %v926_v52, %v2139_v61  ;;  %v946_v16 = vmul.f32 %v1268_v22, %v2196_v32  ;;  %v943_v3 = vand.u32 2147483648, %v2157_v1  ;;  %v574_v56 = vmul.f32 %v411_v34, %v411_v34 }
  0xc2   : > { %v938_v38 = vmul.f32 %v1266_v58, %v937_v7  ;;  %v379_v63 = vadd.f32 %v347_v29, %v314_v4  ;;  %vm942_vm7 = vcmp.eq.f32.partialorder %v2157_v1, 0.0  ;;  %v442_v31 = vmul.f32 %v1368_v18, %v2120_v46 }
  0xc3   : > { %v929_v0 = vsel %vm928_vm4, %v2139_v61, %v927_v57  ;;  %v947_v43 = vmul.f32 %v1268_v22, %v946_v16  ;;  %v475_v61 = vmul.f32 %v1370_v19, %v2117_v62  ;;  %v2250_v27 = vadd.f32 %v1379_v30, %v574_v56 }
  0xc4   : > { %v932_v6 = vsel %vm930_vm5, %v931_v15, %v929_v0  ;;  %v939_v37 = vmul.f32 %v938_v38, %v2157_v1  ;;  %v412_v20 = vadd.f32 %v1361_v11, %v379_v63  ;;  %v539_v35 = vadd.f32 %v1401_v49, %v506_v42 }
  0xc5   : > { %v1020_v13 = vmul.f32 %v1407_v53, %v932_v6  ;;  %v948_v39 = vmul.f32 0.5, %v947_v43  ;;  %1271 = vrsqrt.f32 %v2250_v27  ;;  %v507_v45 = vadd.f32 %v475_v61, %v442_v31 }
  0xc6   : > { %v941_v36 = vsel %vm940_vm6, %v2157_v1, %v939_v37  ;;  %v1270_v58 = vpop.eup %1269  ;;  %v575_v41 = vmul.f32 %v412_v20, %v412_v20  ;;  %vm952_vm8 = vcmp.eq.f32.partialorder %v2196_v32, inf  ;;  %v955_v47 = vand.u32 2147483648, %v2196_v32 }
  0xc7   : > { %v1052_v8 = vadd.f32 %v1020_v13, %v538_v44  ;;  %v944_v25 = vsel %vm942_vm7, %v943_v3, %v941_v36  ;;  %v949_v46 = vsub.f32 1.5, %v948_v39  ;;  %v958_v50 = vmul.f32 %v1270_v58, %v2224_v48 }
  0xc8   : > { %v1021_v62 = vmul.f32 %v1407_v53, %v944_v25  ;;  %vm954_vm9 = vcmp.eq.f32.partialorder %v2196_v32, 0.0  ;;  %v608_v12 = vadd.f32 %v1379_v30, %v575_v41  ;;  %v443_v9 = vmul.f32 %v1368_v18, %v2166_v5 }
  0xc9   : > { %1084 = vst [vmem:[%s1497_s9 + $0xd0] sm:$0xff] %v1052_v8  ;;  %v950_v11 = vmul.f32 %v1268_v22, %v949_v46  ;;  %v959_v1 = vmul.f32 %v1270_v58, %v958_v50  ;;  %v476_v14 = vmul.f32 %v1370_v19, %v2163_v60  ;;  %v540_v21 = vadd.f32 %v1401_v49, %v507_v45 }
  0xca   : > { %v1053_v23 = vadd.f32 %v1021_v62, %v539_v35  ;;  %1273 = vrsqrt.f32 %v608_v12  ;;  %vm964_vm10 = vcmp.eq.f32.partialorder %v2224_v48, inf  ;;  %v967_v60 = vand.u32 2147483648, %v2224_v48 }
  0xcb   : > { %v951_v59 = vmul.f32 %v950_v11, %v2196_v32  ;;  %v960_v55 = vmul.f32 0.5, %v959_v1  ;;  %v1272_v54 = vpop.eup %1271  ;;  %v508_v52 = vadd.f32 %v476_v14, %v443_v9  ;;  %v444_v34 = vmul.f32 %v1368_v18, %v2189_v28 }
  0xcc   : > { %1085 = vst [vmem:[%s1497_s9 + $0xd8] sm:$0xff] %v1053_v23  ;;  %v970_v33 = vmul.f32 %v1272_v54, %v2250_v27  ;;  %vm966_vm11 = vcmp.eq.f32.partialorder %v2224_v48, 0.0  ;;  %v477_v4 = vmul.f32 %v1370_v19, %v2186_v24  ;;  %vm976_vm12 = vcmp.eq.f32.partialorder %v2250_v27, inf }
  0xcd   : > { %v953_v17 = vsel %vm952_vm8, %v2196_v32, %v951_v59  ;;  %v961_v51 = vsub.f32 1.5, %v960_v55  ;;  %v541_v57 = vadd.f32 %v1401_v49, %v508_v52  ;;  %v979_v24 = vand.u32 2147483648, %v2250_v27 }
  0xce   : > { %v956_v26 = vsel %vm954_vm9, %v955_v47, %v953_v17  ;;  %v971_v5 = vmul.f32 %v1272_v54, %v970_v33  ;;  %v509_v0 = vadd.f32 %v477_v4, %v444_v34  ;;  %v445_v6 = vmul.f32 %v1368_v18, %v2217_v2 }
  0xcf   : > { %v1022_v30 = vmul.f32 %v1407_v53, %v956_v26  ;;  %v962_v15 = vmul.f32 %v1270_v58, %v961_v51  ;;  %v478_v43 = vmul.f32 %v1370_v19, %v2214_v10  ;;  %vm978_vm13 = vcmp.eq.f32.partialorder %v2250_v27, 0.0 }
  0xd0   : > { %v972_v29 = vmul.f32 0.5, %v971_v5  ;;  %v1274_v22 = vpop.eup %1273  ;;  %v542_v13 = vadd.f32 %v1401_v49, %v509_v0  ;;  %vm988_vm14 = vcmp.eq.f32.partialorder %v608_v12, inf  ;;  %v991_v19 = vand.u32 2147483648, %v608_v12 }
  0xd1   : > { %v1054_v40 = vadd.f32 %v1022_v30, %v540_v21  ;;  %v963_v32 = vmul.f32 %v962_v15, %v2224_v48  ;;  %v982_v42 = vmul.f32 %v1274_v22, %v608_v12  ;;  %v510_v2 = vadd.f32 %v478_v43, %v445_v6 }
  0xd2   : > { %v973_v44 = vsub.f32 1.5, %v972_v29  ;;  %vm990_vm15 = vcmp.eq.f32.partialorder %v608_v12, 0.0 }
  0xd3   : > { %1086 = vst [vmem:[%s1497_s9 + $0xe0] sm:$0xff] %v1054_v40  ;;  %v965_v7 = vsel %vm964_vm10, %v2224_v48, %v963_v32  ;;  %v983_v3 = vmul.f32 %v1274_v22, %v982_v42  ;;  %v543_v8 = vadd.f32 %v1401_v49, %v510_v2 }
  0xd4   : > { %v968_v16 = vsel %vm966_vm11, %v967_v60, %v965_v7  ;;  %v974_v38 = vmul.f32 %v1272_v54, %v973_v44 }
  0xd5   : > { %v1023_v28 = vmul.f32 %v1407_v53, %v968_v16  ;;  %v984_v63 = vmul.f32 0.5, %v983_v3 }
  0xd6   : > { %v975_v56 = vmul.f32 %v974_v38, %v2250_v27 }
  0xd7   : > { %v1055_v48 = vadd.f32 %v1023_v28, %v541_v57  ;;  %v985_v31 = vsub.f32 1.5, %v984_v63 }
  0xd8   : > { %v977_v37 = vsel %vm976_vm12, %v2250_v27, %v975_v56 }
  0xd9   : > { %1087 = vst [vmem:[%s1497_s9 + $0xe8] sm:$0xff] %v1055_v48  ;;  %v980_v61 = vsel %vm978_vm13, %v979_v24, %v977_v37  ;;  %v986_v39 = vmul.f32 %v1274_v22, %v985_v31 }
  0xda   : > { %v1024_v18 = vmul.f32 %v1407_v53, %v980_v61 }
  0xdb   : > { %v987_v20 = vmul.f32 %v986_v39, %v608_v12 }
  0xdc   : > { %v1056_v10 = vadd.f32 %v1024_v18, %v542_v13 }
  0xdd   : > { %v989_v35 = vsel %vm988_vm14, %v608_v12, %v987_v20 }
  0xde   : > { %1088 = vst [vmem:[%s1497_s9 + $0xf0] sm:$0xff] %v1056_v10  ;;  %v992_v36 = vsel %vm990_vm15, %v991_v19, %v989_v35 }
  0xdf   : > { %v1025_v58 = vmul.f32 %v1407_v53, %v992_v36 }
  0xe1   : > { %v1057_v27 = vadd.f32 %v1025_v58, %v543_v8 }
  0xe3   : > { %1089 = vst [vmem:[%s1497_s9 + $0xf8] sm:$0xff] %v1057_v27 }
  0xe4 PF: > { %s14_s12 = sadd.s32 1, %s1300_s12  }
  0xe5   : > { %p11_p7 = scmp.ge.s32.totalorder %s14_s12, 4  }
  0xe7   :  { %13 = sbr.rel (!%p11_p7) target bundleno = 1 (0x1), region = 70 }
  0xec   :  { %1112 = vsyncpa [#allocation3], 1 }
  0xed   :  { %1114 = vsyncpa [#allocation3 + $0x1], 1 }

</bundles_post_ra>
